<compile_context>
chip_gen: v7x
topology: tpu7x:2x2x1
jax: 0.10.0
libtpu: 0.0.40
codegen_flags: <defaults>
</compile_context>

<pallas_src>
import functools
import numpy as np
import jax
import jax.numpy as jnp
from jax import lax
from jax.experimental import pallas as pl
from jax.experimental.pallas import tpu as pltpu


def _bev_gather_kernel(idx_ref, w_ref, fm_ref, out_ref, *, K):
    """Indexed bilinear gather.

    idx_ref : SMEM (N, 4, K) int32   -- flat HW indices of the 4 corners (clamped in-bounds)
    w_ref   : SMEM (N, 4, K) float32 -- bilinear weights (already zeroed for OOB corners)
    fm_ref  : VMEM (1, HW, TILE_C) float32   (channels-last feature tile)
    out_ref : VMEM (1, K, TILE_C) float32
    """
    n = pl.program_id(0)
    tile_c = out_ref.shape[-1]

    def body(k, carry):
        acc = jnp.zeros((1, tile_c), jnp.float32)
        for c in range(4):                                    # 4 bilinear corners
            row = fm_ref[0, pl.ds(idx_ref[n, c, k], 1), :]    # (1, TILE_C) lane-dense load
            acc = acc + row * w_ref[n, c, k]
        out_ref[0, pl.ds(k, 1), :] = acc.astype(out_ref.dtype)
        return carry

    lax.fori_loop(0, K, body, 0, unroll=(K <= 64))


def _bilinear_corner_tables(keypoint_xyz, H, W, voxel_offset, base_voxel_size, stride):
    """compute_bev_indices + normalize_indices + grid_sample(align_corners=True,
    bilinear, zeros padding) corner math, done once in the wrapper."""
    kx = keypoint_xyz[..., 0]                                 # (N, K)
    ky = keypoint_xyz[..., 1]

    raw_x = (kx - voxel_offset[0]) / (base_voxel_size[0] * stride)
    raw_y = (ky - voxel_offset[1]) / (base_voxel_size[1] * stride)

    # clamp to [0, dim-1] then 2*(v/(dim-2)) - 1 (mirrors the module exactly)
    cx = jnp.clip(raw_x, 0.0, W - 1.0)
    cy = jnp.clip(raw_y, 0.0, H - 1.0)
    nx = 2.0 * (cx / (W - 2.0)) - 1.0
    ny = 2.0 * (cy / (H - 2.0)) - 1.0

    # .flip(3): grid = (ny, nx); grid_sample: grid[...,0] -> W axis, grid[...,1] -> H axis.
    u = (ny + 1.0) * 0.5 * (W - 1.0)                          # column along W
    v = (nx + 1.0) * 0.5 * (H - 1.0)                          # row along H

    u0f = jnp.floor(u)
    v0f = jnp.floor(v)
    fu = u - u0f
    fv = v - v0f
    u0 = u0f.astype(jnp.int32)
    v0 = v0f.astype(jnp.int32)

    idxs, wts = [], []
    for dv, du, w in ((0, 0, (1.0 - fv) * (1.0 - fu)),
                      (0, 1, (1.0 - fv) * fu),
                      (1, 0, fv * (1.0 - fu)),
                      (1, 1, fv * fu)):
        vi = v0 + dv
        ui = u0 + du
        inb = ((ui >= 0) & (ui < W) & (vi >= 0) & (vi < H)).astype(jnp.float32)
        idxs.append(jnp.clip(vi * W + ui, 0, H * W - 1))      # keep dynamic loads in-bounds
        wts.append(w * inb)                                   # zeros padding via masked weight
    idx = jnp.stack(idxs, axis=1).astype(jnp.int32)           # (N, 4, K)
    wgt = jnp.stack(wts, axis=1).astype(jnp.float32)          # (N, 4, K)
    return idx, wgt


def bev_feature_gather(feature_map, keypoint_xyz, voxel_offset, base_voxel_size,
                       stride, *, tile_c=128):
    N, C, H, W = feature_map.shape
    K = keypoint_xyz.shape[1]
    HW = H * W

    idx, wgt = _bilinear_corner_tables(
        keypoint_xyz.astype(jnp.float32), H, W,
        tuple(float(o) for o in voxel_offset),
        tuple(float(s) for s in base_voxel_size), float(stride))

    # Channels-last layout: lane-dense gather rows and output rows.
    fm_t = jnp.transpose(feature_map, (0, 2, 3, 1)).reshape(N, HW, C).astype(jnp.float32)

    tc = min(C, tile_c)
    n_ct = pl.cdiv(C, tc)

    kernel = functools.partial(_bev_gather_kernel, K=K)

    out_kc = pl.pallas_call(
        kernel,
        out_shape=jax.ShapeDtypeStruct((N, K, C), jnp.float32),
        grid_spec=pltpu.PrefetchScalarGridSpec(
            num_scalar_prefetch=1,                            # idx -> SMEM
            grid=(N, n_ct),
            in_specs=[
                pl.BlockSpec(memory_space=pltpu.MemorySpace.SMEM),              # weights
                pl.BlockSpec((1, HW, tc), lambda n, c, idx_ref: (n, 0, c)),     # feature tile
            ],
            out_specs=pl.BlockSpec((1, K, tc), lambda n, c, idx_ref: (n, 0, c)),
        ),
        compiler_params=pltpu.CompilerParams(
            dimension_semantics=("parallel", "parallel")),
    )(idx, wgt, fm_t)

    return jnp.transpose(out_kc, (0, 2, 1))                   # (N, C, K) == grid_sample(...).squeeze(2)


def reference(feature_map, keypoint_xyz, voxel_offset, base_voxel_size, stride):
    """Pure-JAX re-implementation of the PyTorch forward (grid_sample bilinear,
    align_corners=True, zeros padding) for verification."""
    N, C, H, W = feature_map.shape
    off = jnp.asarray(voxel_offset[:2], jnp.float32)
    sz = jnp.asarray(base_voxel_size[:2], jnp.float32)
    indices = (keypoint_xyz[:, :, :2] - off) / (sz * stride)      # (N, K, 2)
    img = jnp.asarray([W - 1, H - 1], jnp.float32)
    indices = jnp.minimum(jnp.maximum(indices, 0.0), img)
    indices = 2.0 * (indices / (img - 1.0)) - 1.0
    grid = indices[..., ::-1]                                     # flip(3)
    gx = grid[..., 0]
    gy = grid[..., 1]
    u = (gx + 1.0) * 0.5 * (W - 1.0)
    v = (gy + 1.0) * 0.5 * (H - 1.0)
    u0 = jnp.floor(u)
    v0 = jnp.floor(v)
    fu = u - u0
    fv = v - v0
    u0 = u0.astype(jnp.int32)
    v0 = v0.astype(jnp.int32)
    fmf = feature_map.reshape(N, C, H * W)
    out = jnp.zeros((N, C, keypoint_xyz.shape[1]), jnp.float32)
    for dv, du, w in [(0, 0, (1 - fv) * (1 - fu)),
                      (0, 1, (1 - fv) * fu),
                      (1, 0, fv * (1 - fu)),
                      (1, 1, fv * fu)]:
        vi = v0 + dv
        ui = u0 + du
        inb = ((ui >= 0) & (ui < W) & (vi >= 0) & (vi < H)).astype(jnp.float32)
        idx = jnp.clip(vi * W + ui, 0, H * W - 1)                 # (N, K)
        vals = jax.vmap(lambda f, i: f[:, i])(fmf, idx)           # (N, C, K)
        out = out + vals * (w * inb)[:, None, :]
    return out


if __name__ == "__main__":
    # Deterministic synthetic config (module __init__ args).
    voxel_offset = (0.0, -40.0, -3.0)        # cfg GRID_BOUNDS lower corner
    base_voxel_size = (0.05, 0.05, 0.1)      # cfg VOXEL_SIZE
    strides = (1, 2, 4, 8)                   # cfg.STRIDES
    stride = strides[-1]

    N, C, H, W, K = 2, 4, 16, 16, 8

    key = jax.random.PRNGKey(0)
    k_fm, k_x, k_y, k_z = jax.random.split(key, 4)
    feature_map = jax.random.normal(k_fm, (N, C, H, W), jnp.float32)
    # Keypoints roughly inside the BEV extent, with some outside to exercise clamp.
    kp_x = jax.random.uniform(k_x, (N, K, 1), jnp.float32, -1.0, 8.0)
    kp_y = jax.random.uniform(k_y, (N, K, 1), jnp.float32, -42.0, -32.0)
    kp_z = jax.random.uniform(k_z, (N, K, 1), jnp.float32, -3.0, 1.0)
    keypoint_xyz = jnp.concatenate([kp_x, kp_y, kp_z], axis=-1)    # (N, K, 3)

    out = bev_feature_gather(feature_map, keypoint_xyz, voxel_offset,
                             base_voxel_size, stride)
    out = jax.block_until_ready(out)

    ref = jax.block_until_ready(
        reference(feature_map, keypoint_xyz, voxel_offset, base_voxel_size,
                  stride))

    np.testing.assert_allclose(np.asarray(out), np.asarray(ref),
                               rtol=1e-5, atol=1e-5)
    print("KERNEL_OK")
</pallas_src>

<mosaic_0001>
module attributes {stable_mosaic.version = 11 : i64} {
  func.func @_bev_gather_kernel(%arg0: i32, %arg1: i32, %arg2: memref<2x4x8xi32, #tpu.memory_space<smem>>, %arg3: memref<2x4x8xf32, #tpu.memory_space<smem>>, %arg4: memref<1x256x4xf32, #tpu.memory_space<vmem>>, %arg5: memref<1x8x4xf32, #tpu.memory_space<vmem>>) attributes {dimension_semantics = [#tpu.dimension_semantics<parallel>, #tpu.dimension_semantics<parallel>], iteration_bounds = array<i64: 2, 1>, scalar_prefetch = 1 : i64, scratch_operands = 0 : i64, tpu.core_type = #tpu.core_type<tc>, window_params = [{transform_indices = @transform_0, window_bounds = array<i64: 2, 4, 8>}, {transform_indices = @transform_1, window_bounds = array<i64: 1, 256, 4>}, {transform_indices = @transform_2, window_bounds = array<i64: 1, 8, 4>}]} {
    %c0_i32 = arith.constant 0 : i32
    %cst = arith.constant 0.000000e+00 : f32
    %0 = vector.broadcast %cst : f32 to vector<1x4xf32>
    %1 = arith.index_cast %arg0 : i32 to index
    %c0 = arith.constant 0 : index
    %2 = arith.index_cast %c0_i32 : i32 to index
    %3 = memref.load %arg2[%1, %c0, %2] : memref<2x4x8xi32, #tpu.memory_space<smem>>
    %c0_0 = arith.constant 0 : index
    %4 = arith.index_cast %3 : i32 to index
    %c0_1 = arith.constant 0 : index
    %5 = vector.load %arg4[%c0_0, %4, %c0_1] : memref<1x256x4xf32, #tpu.memory_space<vmem>>, vector<1x1x4xf32>
    %6 = vector.shape_cast %5 : vector<1x1x4xf32> to vector<1x4xf32>
    %7 = arith.index_cast %arg0 : i32 to index
    %c0_2 = arith.constant 0 : index
    %8 = arith.index_cast %c0_i32 : i32 to index
    %9 = memref.load %arg3[%7, %c0_2, %8] : memref<2x4x8xf32, #tpu.memory_space<smem>>
    %10 = vector.broadcast %9 : f32 to vector<1x4xf32>
    %11 = arith.mulf %6, %10 : vector<1x4xf32>
    %12 = arith.addf %0, %11 : vector<1x4xf32>
    %13 = arith.index_cast %arg0 : i32 to index
    %c1 = arith.constant 1 : index
    %14 = arith.index_cast %c0_i32 : i32 to index
    %15 = memref.load %arg2[%13, %c1, %14] : memref<2x4x8xi32, #tpu.memory_space<smem>>
    %c0_3 = arith.constant 0 : index
    %16 = arith.index_cast %15 : i32 to index
    %c0_4 = arith.constant 0 : index
    %17 = vector.load %arg4[%c0_3, %16, %c0_4] : memref<1x256x4xf32, #tpu.memory_space<vmem>>, vector<1x1x4xf32>
    %18 = vector.shape_cast %17 : vector<1x1x4xf32> to vector<1x4xf32>
    %19 = arith.index_cast %arg0 : i32 to index
    %c1_5 = arith.constant 1 : index
    %20 = arith.index_cast %c0_i32 : i32 to index
    %21 = memref.load %arg3[%19, %c1_5, %20] : memref<2x4x8xf32, #tpu.memory_space<smem>>
    %22 = vector.broadcast %21 : f32 to vector<1x4xf32>
    %23 = arith.mulf %18, %22 : vector<1x4xf32>
    %24 = arith.addf %12, %23 : vector<1x4xf32>
    %25 = arith.index_cast %arg0 : i32 to index
    %c2 = arith.constant 2 : index
    %26 = arith.index_cast %c0_i32 : i32 to index
    %27 = memref.load %arg2[%25, %c2, %26] : memref<2x4x8xi32, #tpu.memory_space<smem>>
    %c0_6 = arith.constant 0 : index
    %28 = arith.index_cast %27 : i32 to index
    %c0_7 = arith.constant 0 : index
    %29 = vector.load %arg4[%c0_6, %28, %c0_7] : memref<1x256x4xf32, #tpu.memory_space<vmem>>, vector<1x1x4xf32>
    %30 = vector.shape_cast %29 : vector<1x1x4xf32> to vector<1x4xf32>
    %31 = arith.index_cast %arg0 : i32 to index
    %c2_8 = arith.constant 2 : index
    %32 = arith.index_cast %c0_i32 : i32 to index
    %33 = memref.load %arg3[%31, %c2_8, %32] : memref<2x4x8xf32, #tpu.memory_space<smem>>
    %34 = vector.broadcast %33 : f32 to vector<1x4xf32>
    %35 = arith.mulf %30, %34 : vector<1x4xf32>
    %36 = arith.addf %24, %35 : vector<1x4xf32>
    %37 = arith.index_cast %arg0 : i32 to index
    %c3 = arith.constant 3 : index
    %38 = arith.index_cast %c0_i32 : i32 to index
    %39 = memref.load %arg2[%37, %c3, %38] : memref<2x4x8xi32, #tpu.memory_space<smem>>
    %c0_9 = arith.constant 0 : index
    %40 = arith.index_cast %39 : i32 to index
    %c0_10 = arith.constant 0 : index
    %41 = vector.load %arg4[%c0_9, %40, %c0_10] : memref<1x256x4xf32, #tpu.memory_space<vmem>>, vector<1x1x4xf32>
    %42 = vector.shape_cast %41 : vector<1x1x4xf32> to vector<1x4xf32>
    %43 = arith.index_cast %arg0 : i32 to index
    %c3_11 = arith.constant 3 : index
    %44 = arith.index_cast %c0_i32 : i32 to index
    %45 = memref.load %arg3[%43, %c3_11, %44] : memref<2x4x8xf32, #tpu.memory_space<smem>>
    %46 = vector.broadcast %45 : f32 to vector<1x4xf32>
    %47 = arith.mulf %42, %46 : vector<1x4xf32>
    %48 = arith.addf %36, %47 : vector<1x4xf32>
    %c0_12 = arith.constant 0 : index
    %49 = arith.index_cast %c0_i32 : i32 to index
    %c0_13 = arith.constant 0 : index
    %50 = vector.load %arg5[%c0_12, %49, %c0_13] : memref<1x8x4xf32, #tpu.memory_space<vmem>>, vector<1x1x4xf32>
    %51 = vector.shape_cast %50 : vector<1x1x4xf32> to vector<1x4xf32>
    %52 = vector.shape_cast %48 : vector<1x4xf32> to vector<1x1x4xf32>
    tpu.vector_store %arg5[%c0_12, %49, %c0_13], %52 {strides = array<i32>} : memref<1x8x4xf32, #tpu.memory_space<vmem>>, vector<1x1x4xf32>,
    %c1_i32 = arith.constant 1 : i32
    %cst_14 = arith.constant 0.000000e+00 : f32
    %53 = vector.broadcast %cst_14 : f32 to vector<1x4xf32>
    %54 = arith.index_cast %arg0 : i32 to index
    %c0_15 = arith.constant 0 : index
    %55 = arith.index_cast %c1_i32 : i32 to index
    %56 = memref.load %arg2[%54, %c0_15, %55] : memref<2x4x8xi32, #tpu.memory_space<smem>>
    %c0_16 = arith.constant 0 : index
    %57 = arith.index_cast %56 : i32 to index
    %c0_17 = arith.constant 0 : index
    %58 = vector.load %arg4[%c0_16, %57, %c0_17] : memref<1x256x4xf32, #tpu.memory_space<vmem>>, vector<1x1x4xf32>
    %59 = vector.shape_cast %58 : vector<1x1x4xf32> to vector<1x4xf32>
    %60 = arith.index_cast %arg0 : i32 to index
    %c0_18 = arith.constant 0 : index
    %61 = arith.index_cast %c1_i32 : i32 to index
    %62 = memref.load %arg3[%60, %c0_18, %61] : memref<2x4x8xf32, #tpu.memory_space<smem>>
    %63 = vector.broadcast %62 : f32 to vector<1x4xf32>
    %64 = arith.mulf %59, %63 : vector<1x4xf32>
    %65 = arith.addf %53, %64 : vector<1x4xf32>
    %66 = arith.index_cast %arg0 : i32 to index
    %c1_19 = arith.constant 1 : index
    %67 = arith.index_cast %c1_i32 : i32 to index
    %68 = memref.load %arg2[%66, %c1_19, %67] : memref<2x4x8xi32, #tpu.memory_space<smem>>
    %c0_20 = arith.constant 0 : index
    %69 = arith.index_cast %68 : i32 to index
    %c0_21 = arith.constant 0 : index
    %70 = vector.load %arg4[%c0_20, %69, %c0_21] : memref<1x256x4xf32, #tpu.memory_space<vmem>>, vector<1x1x4xf32>
    %71 = vector.shape_cast %70 : vector<1x1x4xf32> to vector<1x4xf32>
    %72 = arith.index_cast %arg0 : i32 to index
    %c1_22 = arith.constant 1 : index
    %73 = arith.index_cast %c1_i32 : i32 to index
    %74 = memref.load %arg3[%72, %c1_22, %73] : memref<2x4x8xf32, #tpu.memory_space<smem>>
    %75 = vector.broadcast %74 : f32 to vector<1x4xf32>
    %76 = arith.mulf %71, %75 : vector<1x4xf32>
    %77 = arith.addf %65, %76 : vector<1x4xf32>
    %78 = arith.index_cast %arg0 : i32 to index
    %c2_23 = arith.constant 2 : index
    %79 = arith.index_cast %c1_i32 : i32 to index
    %80 = memref.load %arg2[%78, %c2_23, %79] : memref<2x4x8xi32, #tpu.memory_space<smem>>
    %c0_24 = arith.constant 0 : index
    %81 = arith.index_cast %80 : i32 to index
    %c0_25 = arith.constant 0 : index
    %82 = vector.load %arg4[%c0_24, %81, %c0_25] : memref<1x256x4xf32, #tpu.memory_space<vmem>>, vector<1x1x4xf32>
    %83 = vector.shape_cast %82 : vector<1x1x4xf32> to vector<1x4xf32>
    %84 = arith.index_cast %arg0 : i32 to index
    %c2_26 = arith.constant 2 : index
    %85 = arith.index_cast %c1_i32 : i32 to index
    %86 = memref.load %arg3[%84, %c2_26, %85] : memref<2x4x8xf32, #tpu.memory_space<smem>>
    %87 = vector.broadcast %86 : f32 to vector<1x4xf32>
    %88 = arith.mulf %83, %87 : vector<1x4xf32>
    %89 = arith.addf %77, %88 : vector<1x4xf32>
    %90 = arith.index_cast %arg0 : i32 to index
    %c3_27 = arith.constant 3 : index
    %91 = arith.index_cast %c1_i32 : i32 to index
    %92 = memref.load %arg2[%90, %c3_27, %91] : memref<2x4x8xi32, #tpu.memory_space<smem>>
    %c0_28 = arith.constant 0 : index
    %93 = arith.index_cast %92 : i32 to index
    %c0_29 = arith.constant 0 : index
    %94 = vector.load %arg4[%c0_28, %93, %c0_29] : memref<1x256x4xf32, #tpu.memory_space<vmem>>, vector<1x1x4xf32>
    %95 = vector.shape_cast %94 : vector<1x1x4xf32> to vector<1x4xf32>
    %96 = arith.index_cast %arg0 : i32 to index
    %c3_30 = arith.constant 3 : index
    %97 = arith.index_cast %c1_i32 : i32 to index
    %98 = memref.load %arg3[%96, %c3_30, %97] : memref<2x4x8xf32, #tpu.memory_space<smem>>
    %99 = vector.broadcast %98 : f32 to vector<1x4xf32>
    %100 = arith.mulf %95, %99 : vector<1x4xf32>
    %101 = arith.addf %89, %100 : vector<1x4xf32>
    %c0_31 = arith.constant 0 : index
    %102 = arith.index_cast %c1_i32 : i32 to index
    %c0_32 = arith.constant 0 : index
    %103 = vector.load %arg5[%c0_31, %102, %c0_32] : memref<1x8x4xf32, #tpu.memory_space<vmem>>, vector<1x1x4xf32>
    %104 = vector.shape_cast %103 : vector<1x1x4xf32> to vector<1x4xf32>
    %105 = vector.shape_cast %101 : vector<1x4xf32> to vector<1x1x4xf32>
    tpu.vector_store %arg5[%c0_31, %102, %c0_32], %105 {strides = array<i32>} : memref<1x8x4xf32, #tpu.memory_space<vmem>>, vector<1x1x4xf32>,
    %c2_i32 = arith.constant 2 : i32
    %cst_33 = arith.constant 0.000000e+00 : f32
    %106 = vector.broadcast %cst_33 : f32 to vector<1x4xf32>
    %107 = arith.index_cast %arg0 : i32 to index
    %c0_34 = arith.constant 0 : index
    %108 = arith.index_cast %c2_i32 : i32 to index
    %109 = memref.load %arg2[%107, %c0_34, %108] : memref<2x4x8xi32, #tpu.memory_space<smem>>
    %c0_35 = arith.constant 0 : index
    %110 = arith.index_cast %109 : i32 to index
    %c0_36 = arith.constant 0 : index
    %111 = vector.load %arg4[%c0_35, %110, %c0_36] : memref<1x256x4xf32, #tpu.memory_space<vmem>>, vector<1x1x4xf32>
    %112 = vector.shape_cast %111 : vector<1x1x4xf32> to vector<1x4xf32>
    %113 = arith.index_cast %arg0 : i32 to index
    %c0_37 = arith.constant 0 : index
    %114 = arith.index_cast %c2_i32 : i32 to index
    %115 = memref.load %arg3[%113, %c0_37, %114] : memref<2x4x8xf32, #tpu.memory_space<smem>>
    %116 = vector.broadcast %115 : f32 to vector<1x4xf32>
    %117 = arith.mulf %112, %116 : vector<1x4xf32>
    %118 = arith.addf %106, %117 : vector<1x4xf32>
    %119 = arith.index_cast %arg0 : i32 to index
    %c1_38 = arith.constant 1 : index
    %120 = arith.index_cast %c2_i32 : i32 to index
    %121 = memref.load %arg2[%119, %c1_38, %120] : memref<2x4x8xi32, #tpu.memory_space<smem>>
    %c0_39 = arith.constant 0 : index
    %122 = arith.index_cast %121 : i32 to index
    %c0_40 = arith.constant 0 : index
    %123 = vector.load %arg4[%c0_39, %122, %c0_40] : memref<1x256x4xf32, #tpu.memory_space<vmem>>, vector<1x1x4xf32>
    %124 = vector.shape_cast %123 : vector<1x1x4xf32> to vector<1x4xf32>
    %125 = arith.index_cast %arg0 : i32 to index
    %c1_41 = arith.constant 1 : index
    %126 = arith.index_cast %c2_i32 : i32 to index
    %127 = memref.load %arg3[%125, %c1_41, %126] : memref<2x4x8xf32, #tpu.memory_space<smem>>
    %128 = vector.broadcast %127 : f32 to vector<1x4xf32>
    %129 = arith.mulf %124, %128 : vector<1x4xf32>
    %130 = arith.addf %118, %129 : vector<1x4xf32>
    %131 = arith.index_cast %arg0 : i32 to index
    %c2_42 = arith.constant 2 : index
    %132 = arith.index_cast %c2_i32 : i32 to index
    %133 = memref.load %arg2[%131, %c2_42, %132] : memref<2x4x8xi32, #tpu.memory_space<smem>>
    %c0_43 = arith.constant 0 : index
    %134 = arith.index_cast %133 : i32 to index
    %c0_44 = arith.constant 0 : index
    %135 = vector.load %arg4[%c0_43, %134, %c0_44] : memref<1x256x4xf32, #tpu.memory_space<vmem>>, vector<1x1x4xf32>
    %136 = vector.shape_cast %135 : vector<1x1x4xf32> to vector<1x4xf32>
    %137 = arith.index_cast %arg0 : i32 to index
    %c2_45 = arith.constant 2 : index
    %138 = arith.index_cast %c2_i32 : i32 to index
    %139 = memref.load %arg3[%137, %c2_45, %138] : memref<2x4x8xf32, #tpu.memory_space<smem>>
    %140 = vector.broadcast %139 : f32 to vector<1x4xf32>
    %141 = arith.mulf %136, %140 : vector<1x4xf32>
    %142 = arith.addf %130, %141 : vector<1x4xf32>
    %143 = arith.index_cast %arg0 : i32 to index
    %c3_46 = arith.constant 3 : index
    %144 = arith.index_cast %c2_i32 : i32 to index
    %145 = memref.load %arg2[%143, %c3_46, %144] : memref<2x4x8xi32, #tpu.memory_space<smem>>
    %c0_47 = arith.constant 0 : index
    %146 = arith.index_cast %145 : i32 to index
    %c0_48 = arith.constant 0 : index
    %147 = vector.load %arg4[%c0_47, %146, %c0_48] : memref<1x256x4xf32, #tpu.memory_space<vmem>>, vector<1x1x4xf32>
    %148 = vector.shape_cast %147 : vector<1x1x4xf32> to vector<1x4xf32>
    %149 = arith.index_cast %arg0 : i32 to index
    %c3_49 = arith.constant 3 : index
    %150 = arith.index_cast %c2_i32 : i32 to index
    %151 = memref.load %arg3[%149, %c3_49, %150] : memref<2x4x8xf32, #tpu.memory_space<smem>>
    %152 = vector.broadcast %151 : f32 to vector<1x4xf32>
    %153 = arith.mulf %148, %152 : vector<1x4xf32>
    %154 = arith.addf %142, %153 : vector<1x4xf32>
    %c0_50 = arith.constant 0 : index
    %155 = arith.index_cast %c2_i32 : i32 to index
    %c0_51 = arith.constant 0 : index
    %156 = vector.load %arg5[%c0_50, %155, %c0_51] : memref<1x8x4xf32, #tpu.memory_space<vmem>>, vector<1x1x4xf32>
    %157 = vector.shape_cast %156 : vector<1x1x4xf32> to vector<1x4xf32>
    %158 = vector.shape_cast %154 : vector<1x4xf32> to vector<1x1x4xf32>
    tpu.vector_store %arg5[%c0_50, %155, %c0_51], %158 {strides = array<i32>} : memref<1x8x4xf32, #tpu.memory_space<vmem>>, vector<1x1x4xf32>,
    %c3_i32 = arith.constant 3 : i32
    %cst_52 = arith.constant 0.000000e+00 : f32
    %159 = vector.broadcast %cst_52 : f32 to vector<1x4xf32>
    %160 = arith.index_cast %arg0 : i32 to index
    %c0_53 = arith.constant 0 : index
    %161 = arith.index_cast %c3_i32 : i32 to index
    %162 = memref.load %arg2[%160, %c0_53, %161] : memref<2x4x8xi32, #tpu.memory_space<smem>>
    %c0_54 = arith.constant 0 : index
    %163 = arith.index_cast %162 : i32 to index
    %c0_55 = arith.constant 0 : index
    %164 = vector.load %arg4[%c0_54, %163, %c0_55] : memref<1x256x4xf32, #tpu.memory_space<vmem>>, vector<1x1x4xf32>
    %165 = vector.shape_cast %164 : vector<1x1x4xf32> to vector<1x4xf32>
    %166 = arith.index_cast %arg0 : i32 to index
    %c0_56 = arith.constant 0 : index
    %167 = arith.index_cast %c3_i32 : i32 to index
    %168 = memref.load %arg3[%166, %c0_56, %167] : memref<2x4x8xf32, #tpu.memory_space<smem>>
    %169 = vector.broadcast %168 : f32 to vector<1x4xf32>
    %170 = arith.mulf %165, %169 : vector<1x4xf32>
    %171 = arith.addf %159, %170 : vector<1x4xf32>
    %172 = arith.index_cast %arg0 : i32 to index
    %c1_57 = arith.constant 1 : index
    %173 = arith.index_cast %c3_i32 : i32 to index
    %174 = memref.load %arg2[%172, %c1_57, %173] : memref<2x4x8xi32, #tpu.memory_space<smem>>
    %c0_58 = arith.constant 0 : index
    %175 = arith.index_cast %174 : i32 to index
    %c0_59 = arith.constant 0 : index
    %176 = vector.load %arg4[%c0_58, %175, %c0_59] : memref<1x256x4xf32, #tpu.memory_space<vmem>>, vector<1x1x4xf32>
    %177 = vector.shape_cast %176 : vector<1x1x4xf32> to vector<1x4xf32>
    %178 = arith.index_cast %arg0 : i32 to index
    %c1_60 = arith.constant 1 : index
    %179 = arith.index_cast %c3_i32 : i32 to index
    %180 = memref.load %arg3[%178, %c1_60, %179] : memref<2x4x8xf32, #tpu.memory_space<smem>>
    %181 = vector.broadcast %180 : f32 to vector<1x4xf32>
    %182 = arith.mulf %177, %181 : vector<1x4xf32>
    %183 = arith.addf %171, %182 : vector<1x4xf32>
    %184 = arith.index_cast %arg0 : i32 to index
    %c2_61 = arith.constant 2 : index
    %185 = arith.index_cast %c3_i32 : i32 to index
    %186 = memref.load %arg2[%184, %c2_61, %185] : memref<2x4x8xi32, #tpu.memory_space<smem>>
    %c0_62 = arith.constant 0 : index
    %187 = arith.index_cast %186 : i32 to index
    %c0_63 = arith.constant 0 : index
    %188 = vector.load %arg4[%c0_62, %187, %c0_63] : memref<1x256x4xf32, #tpu.memory_space<vmem>>, vector<1x1x4xf32>
    %189 = vector.shape_cast %188 : vector<1x1x4xf32> to vector<1x4xf32>
    %190 = arith.index_cast %arg0 : i32 to index
    %c2_64 = arith.constant 2 : index
    %191 = arith.index_cast %c3_i32 : i32 to index
    %192 = memref.load %arg3[%190, %c2_64, %191] : memref<2x4x8xf32, #tpu.memory_space<smem>>
    %193 = vector.broadcast %192 : f32 to vector<1x4xf32>
    %194 = arith.mulf %189, %193 : vector<1x4xf32>
    %195 = arith.addf %183, %194 : vector<1x4xf32>
    %196 = arith.index_cast %arg0 : i32 to index
    %c3_65 = arith.constant 3 : index
    %197 = arith.index_cast %c3_i32 : i32 to index
    %198 = memref.load %arg2[%196, %c3_65, %197] : memref<2x4x8xi32, #tpu.memory_space<smem>>
    %c0_66 = arith.constant 0 : index
    %199 = arith.index_cast %198 : i32 to index
    %c0_67 = arith.constant 0 : index
    %200 = vector.load %arg4[%c0_66, %199, %c0_67] : memref<1x256x4xf32, #tpu.memory_space<vmem>>, vector<1x1x4xf32>
    %201 = vector.shape_cast %200 : vector<1x1x4xf32> to vector<1x4xf32>
    %202 = arith.index_cast %arg0 : i32 to index
    %c3_68 = arith.constant 3 : index
    %203 = arith.index_cast %c3_i32 : i32 to index
    %204 = memref.load %arg3[%202, %c3_68, %203] : memref<2x4x8xf32, #tpu.memory_space<smem>>
    %205 = vector.broadcast %204 : f32 to vector<1x4xf32>
    %206 = arith.mulf %201, %205 : vector<1x4xf32>
    %207 = arith.addf %195, %206 : vector<1x4xf32>
    %c0_69 = arith.constant 0 : index
    %208 = arith.index_cast %c3_i32 : i32 to index
    %c0_70 = arith.constant 0 : index
    %209 = vector.load %arg5[%c0_69, %208, %c0_70] : memref<1x8x4xf32, #tpu.memory_space<vmem>>, vector<1x1x4xf32>
    %210 = vector.shape_cast %209 : vector<1x1x4xf32> to vector<1x4xf32>
    %211 = vector.shape_cast %207 : vector<1x4xf32> to vector<1x1x4xf32>
    tpu.vector_store %arg5[%c0_69, %208, %c0_70], %211 {strides = array<i32>} : memref<1x8x4xf32, #tpu.memory_space<vmem>>, vector<1x1x4xf32>,
    %c4_i32 = arith.constant 4 : i32
    %cst_71 = arith.constant 0.000000e+00 : f32
    %212 = vector.broadcast %cst_71 : f32 to vector<1x4xf32>
    %213 = arith.index_cast %arg0 : i32 to index
    %c0_72 = arith.constant 0 : index
    %214 = arith.index_cast %c4_i32 : i32 to index
    %215 = memref.load %arg2[%213, %c0_72, %214] : memref<2x4x8xi32, #tpu.memory_space<smem>>
    %c0_73 = arith.constant 0 : index
    %216 = arith.index_cast %215 : i32 to index
    %c0_74 = arith.constant 0 : index
    %217 = vector.load %arg4[%c0_73, %216, %c0_74] : memref<1x256x4xf32, #tpu.memory_space<vmem>>, vector<1x1x4xf32>
    %218 = vector.shape_cast %217 : vector<1x1x4xf32> to vector<1x4xf32>
    %219 = arith.index_cast %arg0 : i32 to index
    %c0_75 = arith.constant 0 : index
    %220 = arith.index_cast %c4_i32 : i32 to index
    %221 = memref.load %arg3[%219, %c0_75, %220] : memref<2x4x8xf32, #tpu.memory_space<smem>>
    %222 = vector.broadcast %221 : f32 to vector<1x4xf32>
    %223 = arith.mulf %218, %222 : vector<1x4xf32>
    %224 = arith.addf %212, %223 : vector<1x4xf32>
    %225 = arith.index_cast %arg0 : i32 to index
    %c1_76 = arith.constant 1 : index
    %226 = arith.index_cast %c4_i32 : i32 to index
    %227 = memref.load %arg2[%225, %c1_76, %226] : memref<2x4x8xi32, #tpu.memory_space<smem>>
    %c0_77 = arith.constant 0 : index
    %228 = arith.index_cast %227 : i32 to index
    %c0_78 = arith.constant 0 : index
    %229 = vector.load %arg4[%c0_77, %228, %c0_78] : memref<1x256x4xf32, #tpu.memory_space<vmem>>, vector<1x1x4xf32>
    %230 = vector.shape_cast %229 : vector<1x1x4xf32> to vector<1x4xf32>
    %231 = arith.index_cast %arg0 : i32 to index
    %c1_79 = arith.constant 1 : index
    %232 = arith.index_cast %c4_i32 : i32 to index
    %233 = memref.load %arg3[%231, %c1_79, %232] : memref<2x4x8xf32, #tpu.memory_space<smem>>
    %234 = vector.broadcast %233 : f32 to vector<1x4xf32>
    %235 = arith.mulf %230, %234 : vector<1x4xf32>
    %236 = arith.addf %224, %235 : vector<1x4xf32>
    %237 = arith.index_cast %arg0 : i32 to index
    %c2_80 = arith.constant 2 : index
    %238 = arith.index_cast %c4_i32 : i32 to index
    %239 = memref.load %arg2[%237, %c2_80, %238] : memref<2x4x8xi32, #tpu.memory_space<smem>>
    %c0_81 = arith.constant 0 : index
    %240 = arith.index_cast %239 : i32 to index
    %c0_82 = arith.constant 0 : index
    %241 = vector.load %arg4[%c0_81, %240, %c0_82] : memref<1x256x4xf32, #tpu.memory_space<vmem>>, vector<1x1x4xf32>
    %242 = vector.shape_cast %241 : vector<1x1x4xf32> to vector<1x4xf32>
    %243 = arith.index_cast %arg0 : i32 to index
    %c2_83 = arith.constant 2 : index
    %244 = arith.index_cast %c4_i32 : i32 to index
    %245 = memref.load %arg3[%243, %c2_83, %244] : memref<2x4x8xf32, #tpu.memory_space<smem>>
    %246 = vector.broadcast %245 : f32 to vector<1x4xf32>
    %247 = arith.mulf %242, %246 : vector<1x4xf32>
    %248 = arith.addf %236, %247 : vector<1x4xf32>
    %249 = arith.index_cast %arg0 : i32 to index
    %c3_84 = arith.constant 3 : index
    %250 = arith.index_cast %c4_i32 : i32 to index
    %251 = memref.load %arg2[%249, %c3_84, %250] : memref<2x4x8xi32, #tpu.memory_space<smem>>
    %c0_85 = arith.constant 0 : index
    %252 = arith.index_cast %251 : i32 to index
    %c0_86 = arith.constant 0 : index
    %253 = vector.load %arg4[%c0_85, %252, %c0_86] : memref<1x256x4xf32, #tpu.memory_space<vmem>>, vector<1x1x4xf32>
    %254 = vector.shape_cast %253 : vector<1x1x4xf32> to vector<1x4xf32>
    %255 = arith.index_cast %arg0 : i32 to index
    %c3_87 = arith.constant 3 : index
    %256 = arith.index_cast %c4_i32 : i32 to index
    %257 = memref.load %arg3[%255, %c3_87, %256] : memref<2x4x8xf32, #tpu.memory_space<smem>>
    %258 = vector.broadcast %257 : f32 to vector<1x4xf32>
    %259 = arith.mulf %254, %258 : vector<1x4xf32>
    %260 = arith.addf %248, %259 : vector<1x4xf32>
    %c0_88 = arith.constant 0 : index
    %261 = arith.index_cast %c4_i32 : i32 to index
    %c0_89 = arith.constant 0 : index
    %262 = vector.load %arg5[%c0_88, %261, %c0_89] : memref<1x8x4xf32, #tpu.memory_space<vmem>>, vector<1x1x4xf32>
    %263 = vector.shape_cast %262 : vector<1x1x4xf32> to vector<1x4xf32>
    %264 = vector.shape_cast %260 : vector<1x4xf32> to vector<1x1x4xf32>
    tpu.vector_store %arg5[%c0_88, %261, %c0_89], %264 {strides = array<i32>} : memref<1x8x4xf32, #tpu.memory_space<vmem>>, vector<1x1x4xf32>,
    %c5_i32 = arith.constant 5 : i32
    %cst_90 = arith.constant 0.000000e+00 : f32
    %265 = vector.broadcast %cst_90 : f32 to vector<1x4xf32>
    %266 = arith.index_cast %arg0 : i32 to index
    %c0_91 = arith.constant 0 : index
    %267 = arith.index_cast %c5_i32 : i32 to index
    %268 = memref.load %arg2[%266, %c0_91, %267] : memref<2x4x8xi32, #tpu.memory_space<smem>>
    %c0_92 = arith.constant 0 : index
    %269 = arith.index_cast %268 : i32 to index
    %c0_93 = arith.constant 0 : index
    %270 = vector.load %arg4[%c0_92, %269, %c0_93] : memref<1x256x4xf32, #tpu.memory_space<vmem>>, vector<1x1x4xf32>
    %271 = vector.shape_cast %270 : vector<1x1x4xf32> to vector<1x4xf32>
    %272 = arith.index_cast %arg0 : i32 to index
    %c0_94 = arith.constant 0 : index
    %273 = arith.index_cast %c5_i32 : i32 to index
    %274 = memref.load %arg3[%272, %c0_94, %273] : memref<2x4x8xf32, #tpu.memory_space<smem>>
    %275 = vector.broadcast %274 : f32 to vector<1x4xf32>
    %276 = arith.mulf %271, %275 : vector<1x4xf32>
    %277 = arith.addf %265, %276 : vector<1x4xf32>
    %278 = arith.index_cast %arg0 : i32 to index
    %c1_95 = arith.constant 1 : index
    %279 = arith.index_cast %c5_i32 : i32 to index
    %280 = memref.load %arg2[%278, %c1_95, %279] : memref<2x4x8xi32, #tpu.memory_space<smem>>
    %c0_96 = arith.constant 0 : index
    %281 = arith.index_cast %280 : i32 to index
    %c0_97 = arith.constant 0 : index
    %282 = vector.load %arg4[%c0_96, %281, %c0_97] : memref<1x256x4xf32, #tpu.memory_space<vmem>>, vector<1x1x4xf32>
    %283 = vector.shape_cast %282 : vector<1x1x4xf32> to vector<1x4xf32>
    %284 = arith.index_cast %arg0 : i32 to index
    %c1_98 = arith.constant 1 : index
    %285 = arith.index_cast %c5_i32 : i32 to index
    %286 = memref.load %arg3[%284, %c1_98, %285] : memref<2x4x8xf32, #tpu.memory_space<smem>>
    %287 = vector.broadcast %286 : f32 to vector<1x4xf32>
    %288 = arith.mulf %283, %287 : vector<1x4xf32>
    %289 = arith.addf %277, %288 : vector<1x4xf32>
    %290 = arith.index_cast %arg0 : i32 to index
    %c2_99 = arith.constant 2 : index
    %291 = arith.index_cast %c5_i32 : i32 to index
    %292 = memref.load %arg2[%290, %c2_99, %291] : memref<2x4x8xi32, #tpu.memory_space<smem>>
    %c0_100 = arith.constant 0 : index
    %293 = arith.index_cast %292 : i32 to index
    %c0_101 = arith.constant 0 : index
    %294 = vector.load %arg4[%c0_100, %293, %c0_101] : memref<1x256x4xf32, #tpu.memory_space<vmem>>, vector<1x1x4xf32>
    %295 = vector.shape_cast %294 : vector<1x1x4xf32> to vector<1x4xf32>
    %296 = arith.index_cast %arg0 : i32 to index
    %c2_102 = arith.constant 2 : index
    %297 = arith.index_cast %c5_i32 : i32 to index
    %298 = memref.load %arg3[%296, %c2_102, %297] : memref<2x4x8xf32, #tpu.memory_space<smem>>
    %299 = vector.broadcast %298 : f32 to vector<1x4xf32>
    %300 = arith.mulf %295, %299 : vector<1x4xf32>
    %301 = arith.addf %289, %300 : vector<1x4xf32>
    %302 = arith.index_cast %arg0 : i32 to index
    %c3_103 = arith.constant 3 : index
    %303 = arith.index_cast %c5_i32 : i32 to index
    %304 = memref.load %arg2[%302, %c3_103, %303] : memref<2x4x8xi32, #tpu.memory_space<smem>>
    %c0_104 = arith.constant 0 : index
    %305 = arith.index_cast %304 : i32 to index
    %c0_105 = arith.constant 0 : index
    %306 = vector.load %arg4[%c0_104, %305, %c0_105] : memref<1x256x4xf32, #tpu.memory_space<vmem>>, vector<1x1x4xf32>
    %307 = vector.shape_cast %306 : vector<1x1x4xf32> to vector<1x4xf32>
    %308 = arith.index_cast %arg0 : i32 to index
    %c3_106 = arith.constant 3 : index
    %309 = arith.index_cast %c5_i32 : i32 to index
    %310 = memref.load %arg3[%308, %c3_106, %309] : memref<2x4x8xf32, #tpu.memory_space<smem>>
    %311 = vector.broadcast %310 : f32 to vector<1x4xf32>
    %312 = arith.mulf %307, %311 : vector<1x4xf32>
    %313 = arith.addf %301, %312 : vector<1x4xf32>
    %c0_107 = arith.constant 0 : index
    %314 = arith.index_cast %c5_i32 : i32 to index
    %c0_108 = arith.constant 0 : index
    %315 = vector.load %arg5[%c0_107, %314, %c0_108] : memref<1x8x4xf32, #tpu.memory_space<vmem>>, vector<1x1x4xf32>
    %316 = vector.shape_cast %315 : vector<1x1x4xf32> to vector<1x4xf32>
    %317 = vector.shape_cast %313 : vector<1x4xf32> to vector<1x1x4xf32>
    tpu.vector_store %arg5[%c0_107, %314, %c0_108], %317 {strides = array<i32>} : memref<1x8x4xf32, #tpu.memory_space<vmem>>, vector<1x1x4xf32>,
    %c6_i32 = arith.constant 6 : i32
    %cst_109 = arith.constant 0.000000e+00 : f32
    %318 = vector.broadcast %cst_109 : f32 to vector<1x4xf32>
    %319 = arith.index_cast %arg0 : i32 to index
    %c0_110 = arith.constant 0 : index
    %320 = arith.index_cast %c6_i32 : i32 to index
    %321 = memref.load %arg2[%319, %c0_110, %320] : memref<2x4x8xi32, #tpu.memory_space<smem>>
    %c0_111 = arith.constant 0 : index
    %322 = arith.index_cast %321 : i32 to index
    %c0_112 = arith.constant 0 : index
    %323 = vector.load %arg4[%c0_111, %322, %c0_112] : memref<1x256x4xf32, #tpu.memory_space<vmem>>, vector<1x1x4xf32>
    %324 = vector.shape_cast %323 : vector<1x1x4xf32> to vector<1x4xf32>
    %325 = arith.index_cast %arg0 : i32 to index
    %c0_113 = arith.constant 0 : index
    %326 = arith.index_cast %c6_i32 : i32 to index
    %327 = memref.load %arg3[%325, %c0_113, %326] : memref<2x4x8xf32, #tpu.memory_space<smem>>
    %328 = vector.broadcast %327 : f32 to vector<1x4xf32>
    %329 = arith.mulf %324, %328 : vector<1x4xf32>
    %330 = arith.addf %318, %329 : vector<1x4xf32>
    %331 = arith.index_cast %arg0 : i32 to index
    %c1_114 = arith.constant 1 : index
    %332 = arith.index_cast %c6_i32 : i32 to index
    %333 = memref.load %arg2[%331, %c1_114, %332] : memref<2x4x8xi32, #tpu.memory_space<smem>>
    %c0_115 = arith.constant 0 : index
    %334 = arith.index_cast %333 : i32 to index
    %c0_116 = arith.constant 0 : index
    %335 = vector.load %arg4[%c0_115, %334, %c0_116] : memref<1x256x4xf32, #tpu.memory_space<vmem>>, vector<1x1x4xf32>
    %336 = vector.shape_cast %335 : vector<1x1x4xf32> to vector<1x4xf32>
    %337 = arith.index_cast %arg0 : i32 to index
    %c1_117 = arith.constant 1 : index
    %338 = arith.index_cast %c6_i32 : i32 to index
    %339 = memref.load %arg3[%337, %c1_117, %338] : memref<2x4x8xf32, #tpu.memory_space<smem>>
    %340 = vector.broadcast %339 : f32 to vector<1x4xf32>
    %341 = arith.mulf %336, %340 : vector<1x4xf32>
    %342 = arith.addf %330, %341 : vector<1x4xf32>
    %343 = arith.index_cast %arg0 : i32 to index
    %c2_118 = arith.constant 2 : index
    %344 = arith.index_cast %c6_i32 : i32 to index
    %345 = memref.load %arg2[%343, %c2_118, %344] : memref<2x4x8xi32, #tpu.memory_space<smem>>
    %c0_119 = arith.constant 0 : index
    %346 = arith.index_cast %345 : i32 to index
    %c0_120 = arith.constant 0 : index
    %347 = vector.load %arg4[%c0_119, %346, %c0_120] : memref<1x256x4xf32, #tpu.memory_space<vmem>>, vector<1x1x4xf32>
    %348 = vector.shape_cast %347 : vector<1x1x4xf32> to vector<1x4xf32>
    %349 = arith.index_cast %arg0 : i32 to index
    %c2_121 = arith.constant 2 : index
    %350 = arith.index_cast %c6_i32 : i32 to index
    %351 = memref.load %arg3[%349, %c2_121, %350] : memref<2x4x8xf32, #tpu.memory_space<smem>>
    %352 = vector.broadcast %351 : f32 to vector<1x4xf32>
    %353 = arith.mulf %348, %352 : vector<1x4xf32>
    %354 = arith.addf %342, %353 : vector<1x4xf32>
    %355 = arith.index_cast %arg0 : i32 to index
    %c3_122 = arith.constant 3 : index
    %356 = arith.index_cast %c6_i32 : i32 to index
    %357 = memref.load %arg2[%355, %c3_122, %356] : memref<2x4x8xi32, #tpu.memory_space<smem>>
    %c0_123 = arith.constant 0 : index
    %358 = arith.index_cast %357 : i32 to index
    %c0_124 = arith.constant 0 : index
    %359 = vector.load %arg4[%c0_123, %358, %c0_124] : memref<1x256x4xf32, #tpu.memory_space<vmem>>, vector<1x1x4xf32>
    %360 = vector.shape_cast %359 : vector<1x1x4xf32> to vector<1x4xf32>
    %361 = arith.index_cast %arg0 : i32 to index
    %c3_125 = arith.constant 3 : index
    %362 = arith.index_cast %c6_i32 : i32 to index
    %363 = memref.load %arg3[%361, %c3_125, %362] : memref<2x4x8xf32, #tpu.memory_space<smem>>
    %364 = vector.broadcast %363 : f32 to vector<1x4xf32>
    %365 = arith.mulf %360, %364 : vector<1x4xf32>
    %366 = arith.addf %354, %365 : vector<1x4xf32>
    %c0_126 = arith.constant 0 : index
    %367 = arith.index_cast %c6_i32 : i32 to index
    %c0_127 = arith.constant 0 : index
    %368 = vector.load %arg5[%c0_126, %367, %c0_127] : memref<1x8x4xf32, #tpu.memory_space<vmem>>, vector<1x1x4xf32>
    %369 = vector.shape_cast %368 : vector<1x1x4xf32> to vector<1x4xf32>
    %370 = vector.shape_cast %366 : vector<1x4xf32> to vector<1x1x4xf32>
    tpu.vector_store %arg5[%c0_126, %367, %c0_127], %370 {strides = array<i32>} : memref<1x8x4xf32, #tpu.memory_space<vmem>>, vector<1x1x4xf32>,
    %c7_i32 = arith.constant 7 : i32
    %cst_128 = arith.constant 0.000000e+00 : f32
    %371 = vector.broadcast %cst_128 : f32 to vector<1x4xf32>
    %372 = arith.index_cast %arg0 : i32 to index
    %c0_129 = arith.constant 0 : index
    %373 = arith.index_cast %c7_i32 : i32 to index
    %374 = memref.load %arg2[%372, %c0_129, %373] : memref<2x4x8xi32, #tpu.memory_space<smem>>
    %c0_130 = arith.constant 0 : index
    %375 = arith.index_cast %374 : i32 to index
    %c0_131 = arith.constant 0 : index
    %376 = vector.load %arg4[%c0_130, %375, %c0_131] : memref<1x256x4xf32, #tpu.memory_space<vmem>>, vector<1x1x4xf32>
    %377 = vector.shape_cast %376 : vector<1x1x4xf32> to vector<1x4xf32>
    %378 = arith.index_cast %arg0 : i32 to index
    %c0_132 = arith.constant 0 : index
    %379 = arith.index_cast %c7_i32 : i32 to index
    %380 = memref.load %arg3[%378, %c0_132, %379] : memref<2x4x8xf32, #tpu.memory_space<smem>>
    %381 = vector.broadcast %380 : f32 to vector<1x4xf32>
    %382 = arith.mulf %377, %381 : vector<1x4xf32>
    %383 = arith.addf %371, %382 : vector<1x4xf32>
    %384 = arith.index_cast %arg0 : i32 to index
    %c1_133 = arith.constant 1 : index
    %385 = arith.index_cast %c7_i32 : i32 to index
    %386 = memref.load %arg2[%384, %c1_133, %385] : memref<2x4x8xi32, #tpu.memory_space<smem>>
    %c0_134 = arith.constant 0 : index
    %387 = arith.index_cast %386 : i32 to index
    %c0_135 = arith.constant 0 : index
    %388 = vector.load %arg4[%c0_134, %387, %c0_135] : memref<1x256x4xf32, #tpu.memory_space<vmem>>, vector<1x1x4xf32>
    %389 = vector.shape_cast %388 : vector<1x1x4xf32> to vector<1x4xf32>
    %390 = arith.index_cast %arg0 : i32 to index
    %c1_136 = arith.constant 1 : index
    %391 = arith.index_cast %c7_i32 : i32 to index
    %392 = memref.load %arg3[%390, %c1_136, %391] : memref<2x4x8xf32, #tpu.memory_space<smem>>
    %393 = vector.broadcast %392 : f32 to vector<1x4xf32>
    %394 = arith.mulf %389, %393 : vector<1x4xf32>
    %395 = arith.addf %383, %394 : vector<1x4xf32>
    %396 = arith.index_cast %arg0 : i32 to index
    %c2_137 = arith.constant 2 : index
    %397 = arith.index_cast %c7_i32 : i32 to index
    %398 = memref.load %arg2[%396, %c2_137, %397] : memref<2x4x8xi32, #tpu.memory_space<smem>>
    %c0_138 = arith.constant 0 : index
    %399 = arith.index_cast %398 : i32 to index
    %c0_139 = arith.constant 0 : index
    %400 = vector.load %arg4[%c0_138, %399, %c0_139] : memref<1x256x4xf32, #tpu.memory_space<vmem>>, vector<1x1x4xf32>
    %401 = vector.shape_cast %400 : vector<1x1x4xf32> to vector<1x4xf32>
    %402 = arith.index_cast %arg0 : i32 to index
    %c2_140 = arith.constant 2 : index
    %403 = arith.index_cast %c7_i32 : i32 to index
    %404 = memref.load %arg3[%402, %c2_140, %403] : memref<2x4x8xf32, #tpu.memory_space<smem>>
    %405 = vector.broadcast %404 : f32 to vector<1x4xf32>
    %406 = arith.mulf %401, %405 : vector<1x4xf32>
    %407 = arith.addf %395, %406 : vector<1x4xf32>
    %408 = arith.index_cast %arg0 : i32 to index
    %c3_141 = arith.constant 3 : index
    %409 = arith.index_cast %c7_i32 : i32 to index
    %410 = memref.load %arg2[%408, %c3_141, %409] : memref<2x4x8xi32, #tpu.memory_space<smem>>
    %c0_142 = arith.constant 0 : index
    %411 = arith.index_cast %410 : i32 to index
    %c0_143 = arith.constant 0 : index
    %412 = vector.load %arg4[%c0_142, %411, %c0_143] : memref<1x256x4xf32, #tpu.memory_space<vmem>>, vector<1x1x4xf32>
    %413 = vector.shape_cast %412 : vector<1x1x4xf32> to vector<1x4xf32>
    %414 = arith.index_cast %arg0 : i32 to index
    %c3_144 = arith.constant 3 : index
    %415 = arith.index_cast %c7_i32 : i32 to index
    %416 = memref.load %arg3[%414, %c3_144, %415] : memref<2x4x8xf32, #tpu.memory_space<smem>>
    %417 = vector.broadcast %416 : f32 to vector<1x4xf32>
    %418 = arith.mulf %413, %417 : vector<1x4xf32>
    %419 = arith.addf %407, %418 : vector<1x4xf32>
    %c0_145 = arith.constant 0 : index
    %420 = arith.index_cast %c7_i32 : i32 to index
    %c0_146 = arith.constant 0 : index
    %421 = vector.load %arg5[%c0_145, %420, %c0_146] : memref<1x8x4xf32, #tpu.memory_space<vmem>>, vector<1x1x4xf32>
    %422 = vector.shape_cast %421 : vector<1x1x4xf32> to vector<1x4xf32>
    %423 = vector.shape_cast %419 : vector<1x4xf32> to vector<1x1x4xf32>
    tpu.vector_store %arg5[%c0_145, %420, %c0_146], %423 {strides = array<i32>} : memref<1x8x4xf32, #tpu.memory_space<vmem>>, vector<1x1x4xf32>,
    %c8_i32 = arith.constant 8 : i32
    return
  }
  func.func @transform_0(%arg0: i32, %arg1: i32, %arg2: memref<2x4x8xi32, #tpu.memory_space<smem>>) -> (i32, i32, i32) {
    %c0_i32 = arith.constant 0 : i32
    %c0_i32_0 = arith.constant 0 : i32
    %c0_i32_1 = arith.constant 0 : i32
    %c0_i32_2 = arith.constant 0 : i32
    return %c0_i32, %c0_i32_0, %c0_i32_1 : i32, i32, i32
  }
  func.func @transform_1(%arg0: i32, %arg1: i32, %arg2: memref<2x4x8xi32, #tpu.memory_space<smem>>) -> (i32, i32, i32) {
    %c0_i32 = arith.constant 0 : i32
    %c0_i32_0 = arith.constant 0 : i32
    return %arg0, %c0_i32, %arg1 : i32, i32, i32
  }
  func.func @transform_2(%arg0: i32, %arg1: i32, %arg2: memref<2x4x8xi32, #tpu.memory_space<smem>>) -> (i32, i32, i32) {
    %c0_i32 = arith.constant 0 : i32
    %c0_i32_0 = arith.constant 0 : i32
    return %arg0, %c0_i32, %arg1 : i32, i32, i32
  }
}

</mosaic_0001>

<bundles_post_ra>
// kernel: tpu_custom_call.1
= control target key start
LH: loop header
LB: loop body
LE: loop exit
PB: predicated region body
PF: predicated region fallthrough
CT: control target
= control target key end

     0   :  { %s904_s0 = inlined_call_operand.vmem [shape: s32[2,4,8], index: 0, kind: input, shape index: {}]   ;;  %s905_s1 = inlined_call_operand.vmem [shape: f32[2,4,8], index: 1, kind: input, shape index: {}]   ;;  %s906_s2 = inlined_call_operand.vmem [shape: f32[2,256,4], index: 2, kind: input, shape index: {}]   ;;  %s907_s3 = inlined_call_operand.vmem [shape: f32[2,8,4], index: 3, kind: output, shape index: {}]  }
   0x1   :  { %s8_s14 = sshll.u32 %s904_s0, 4  ;;  %s9_s14 = int_to_ptr.vmem [resolvable:$true] %s8_s14 }
   0x2   :  { %s653_s15 = scalar_lea.vmem %s9_s14, 128  ;;  %p658_p1 = scmp.lt.s32.totalorder %s9_s14, %s9_s14 }
   0x3   :  { %p654_p0 = scmp.ne.s32.totalorder %s9_s14, %s653_s15  ;;  %p659_p2 = scmp.lt.s32.totalorder %s653_s15, %s653_s15 }
   0x5   :  { %p660_p3 = por %p659_p2, %p658_p1 }
   0x7   :  { %p661_p4 = pnand %p660_p3, %p654_p0 }
   0x9   :  { %664 = shalt.err (!%p661_p4)  }
   0xa   :  { %s710_s16 = smov [#allocation3]  }
   0xb   :  { %11 = dma.vmem_to_smem %s9_s14, 128, %s710_s16, [#allocation2] }
   0xc   :  { %692 = dma.done.wait [#allocation2], 128 }
   0xd   :  { %693 = vsyncadd [#allocation2], 4294967168 }
   0xe   :  { %13 = sfence }
   0xf   :  { %14 = vsyncpa [#allocation5], 0  ;;  %s737_s17 = smov 0   ;;  %s739_s18 = smov 0  }
  0x10   :  { %s741_s19 = smov 0  }
  0x11 LB: > { %s587_s0 = sadd.s32 4294967295, %s708_s19   ;;  %s32_s20 = sadd.s32 1, %s704_s18  ;;  %s708_s19 = sphi %s741_s19, %s20_s19   ;;  %s704_s18 = sphi %s739_s18, %s912_s18   ;;  %s700_s17 = sphi %s737_s17, %s911_s17  }
  0x12   : > { %p34_p5 = scmp.ge.s32.totalorder %s32_s20, 2  ;;  %p589_p6 = scmp.ge.s32.totalorder %s708_s19, 1 }
  0x13   : > { %p114_p7 = scmp.lt.s32.totalorder %s708_s19, 3  ;;  %p762_p9 = scmp.eq.s32.totalorder %s587_s0, 0 }
  0x14   : > { %s914_s20 = smov (%p34_p5, %s32_s20), 0  ;;  %s126_s25 = sshll.u32 %s905_s1, 4  ;;  %s127_s25 = int_to_ptr.vmem [resolvable:$true] %s126_s25 }
  0x15   : > { %p758_p8 = pnand %p589_p6, %p114_p7  ;;  %s665_s27 = scalar_lea.vmem %s127_s25, 128 }
  0x16   : > { %p666_p12 = scmp.ne.s32.totalorder %s127_s25, %s665_s27  ;;  %p673_p2 = scmp.lt.s32.totalorder %s127_s25, %s127_s25 }
  0x17   : > { %p619_p10 = pneg %p758_p8  ;;  %p674_p3 = scmp.lt.s32.totalorder %s665_s27, %s665_s27 }
  0x19   : > { %p773_p11 = pnand %p762_p9, %p619_p10  ;;  %p675_p4 = por %p674_p3, %p673_p2 }
  0x1b   : > { %p667_p13 = pneg %p773_p11 }
  0x1d   : > { %p668_p0 = pnand %p667_p13, %p666_p12 }
  0x1f   : > { %p669_p1 = pneg %p668_p0 }
  0x21   : > { %p676_p5 = pnand %p675_p4, %p669_p1 }
  0x23   : > { %679 = shalt.err (!%p676_p5)
}
  0x24   : > { %s711_s28 = smov [#allocation4]   ;;  %s712_s29 = smov 64  }
  0x25   : > { %s713_s30 = smov 4   ;;  %153 = sbr.rel (%p758_p8) target bundleno = 125 (0x7d), region = 28 }
  0x26   : > { %622 = dma.vmem_to_smem (!%p773_p11), %s127_s25, 128, %s711_s28, [#allocation5], %s712_s29, %s712_s29, %s713_s30  }
  0x2c   : > { %695 = dma.done.wait (%p762_p9), [#allocation5], 128  }
  0x2d   : > { %697 = vsyncadd (%p762_p9), [#allocation5], 4294967168 }
  0x2e   : > { %159 = sfence }
  0x2f   : > { %p181_p6 = scmp.lt.s32.totalorder %s700_s17, 1  ;;  %s789_s4 = sshll.u32 %s700_s17, 9  ;;  %vm232_vm0 = vcmask 24576  }
  0x30   : > { %s198_s5 = sld [smem:[#allocation3 + %s789_s4]]  ;;  %s795_s7 = sadd.s32 128, %s789_s4 }
  0x31   : > { %s201_s6 = sld [smem:[#allocation4 + %s789_s4]]  ;;  %s916_s17 = smov (!%p181_p6, %s700_s17), 1 }
  0x32   : > { %s798_s8 = sadd.s32 256, %s789_s4  ;;  %s604_s9 = sshll.u32 %s916_s17, 8 }
  0x33   : > { %s596_s10 = sshll.u32 %s916_s17, 3  ;;  %s803_s13 = scalar_lea.vmem %s906_s2, %s604_s9 }
  0x34   : > { %s808_s16 = scalar_lea.vmem %s907_s3, %s596_s10  ;;  %s207_s0 = sld [smem:[#allocation3 + %s795_s7]] }
  0x35   : > { %s210_s21 = sld [smem:[#allocation4 + %s795_s7]]  ;;  %s816_s25 = sadd.s32 384, %s789_s4 }
  0x36   : > { %s199_s22 = scalar_lea.vmem %s803_s13, %s198_s5  ;;  %s216_s23 = sld [smem:[#allocation3 + %s798_s8]] }
  0x37   : > { %s219_s24 = sld [smem:[#allocation4 + %s798_s8]]  ;;  %v200_v0 = vld [vmem:[%s199_s22] sm:$0x1]  ;;  %v202_v1 = vstv %s201_s6  ;;  %s234_s27 = sadd.s32 1, %s789_s4 }
  0x38   : > { %s225_s17 = sld [smem:[#allocation3 + %s816_s25]]  ;;  %s242_s28 = sadd.s32 1, %s795_s7  ;;  %v203_v2 = vmul.f32 %v202_v1, %v200_v0 }
  0x39   : > { %s228_s26 = sld [smem:[#allocation4 + %s816_s25]]  ;;  %s250_s6 = sadd.s32 1, %s798_s8 }
  0x3a   : > { %s235_s29 = sld [smem:[#allocation3 + %s234_s27]]  ;;  %s208_s5 = scalar_lea.vmem %s803_s13, %s207_s0 }
  0x3b   : > { %s238_s30 = sld [smem:[#allocation4 + %s234_s27]]  ;;  %v211_v3 = vstv %s210_s21  ;;  %v209_v4 = vld [vmem:[%s208_s5] sm:$0x1]  ;;  %s258_s12 = sadd.s32 1, %s816_s25 }
  0x3c   : > { %s243_s9 = sld [smem:[#allocation3 + %s242_s28]]  ;;  %s217_s10 = scalar_lea.vmem %s803_s13, %s216_s23  ;;  %v212_v5 = vmul.f32 %v211_v3, %v209_v4 }
  0x3d   : > { %s246_s11 = sld [smem:[#allocation4 + %s242_s28]]  ;;  %v218_v6 = vld [vmem:[%s217_s10] sm:$0x1]  ;;  %v220_v7 = vstv %s219_s24  ;;  %s267_s27 = sadd.s32 2, %s789_s4 }
  0x3e   : > { %v221_v8 = vmul.f32 %v220_v7, %v218_v6  ;;  %s226_s14 = scalar_lea.vmem %s803_s13, %s225_s17  ;;  %s251_s15 = sld [smem:[#allocation3 + %s250_s6]]  ;;  %v213_v10 = vadd.f32 %v212_v5, %v203_v2 }
  0x3f   : > { %v229_v9 = vstv %s228_s26  ;;  %v227_v11 = vld [vmem:[%s226_s14] sm:$0x1]  ;;  %s254_s0 = sld [smem:[#allocation4 + %s250_s6]]  ;;  %s275_s28 = sadd.s32 2, %s795_s7 }
  0x40   : > { %s259_s21 = sld [smem:[#allocation3 + %s258_s12]]  ;;  %v230_v12 = vmul.f32 %v229_v9, %v227_v11  ;;  %s236_s22 = scalar_lea.vmem %s803_s13, %s235_s29  ;;  %v222_v14 = vadd.f32 %v221_v8, %v213_v10 }
  0x41   : > { %v239_v13 = vstv %s238_s30  ;;  %s262_s23 = sld [smem:[#allocation4 + %s258_s12]]  ;;  %v237_v15 = vld [vmem:[%s236_s22] sm:$0x1]  ;;  %s283_s29 = sadd.s32 2, %s798_s8 }
  0x42   : > { %s244_s24 = scalar_lea.vmem %s803_s13, %s243_s9  ;;  %v240_v16 = vmul.f32 %v239_v13, %v237_v15  ;;  %s268_s17 = sld [smem:[#allocation3 + %s267_s27]]  ;;  %v231_v19 = vadd.f32 %v230_v12, %v222_v14 }
  0x43   : > { %v245_v17 = vld [vmem:[%s244_s24] sm:$0x1]  ;;  %v247_v18 = vstv %s246_s11  ;;  %s271_s26 = sld [smem:[#allocation4 + %s267_s27]]  ;;  %s291_s12 = sadd.s32 2, %s816_s25 }
  0x44   : > { %v248_v20 = vmul.f32 %v247_v18, %v245_v17  ;;  %s252_s30 = scalar_lea.vmem %s803_s13, %s251_s15  ;;  %s276_s5 = sld [smem:[#allocation3 + %s275_s28]]  ;;  %233 = vst.msk [vmem:[%s808_s16] sm:$0x1] %vm232_vm0, %v231_v19 }
  0x45   : > { %v253_v22 = vld [vmem:[%s252_s30] sm:$0x1]  ;;  %v255_v23 = vstv %s254_s0  ;;  %s279_s10 = sld [smem:[#allocation4 + %s275_s28]]  ;;  %s300_s14 = sadd.s32 3, %s789_s4 }
  0x46   : > { %v249_v21 = vadd.f32 %v248_v20, %v240_v16  ;;  %s260_s9 = scalar_lea.vmem %s803_s13, %s259_s21  ;;  %v256_v24 = vmul.f32 %v255_v23, %v253_v22  ;;  %s284_s11 = sld [smem:[#allocation3 + %s283_s29]] }
  0x47   : > { %v261_v25 = vld [vmem:[%s260_s9] sm:$0x1]  ;;  %v263_v26 = vstv %s262_s23  ;;  %s287_s6 = sld [smem:[#allocation4 + %s283_s29]]  ;;  %s308_s27 = sadd.s32 3, %s795_s7 }
  0x48   : > { %v264_v27 = vmul.f32 %v263_v26, %v261_v25  ;;  %v257_v28 = vadd.f32 %v256_v24, %v249_v21  ;;  %s269_s15 = scalar_lea.vmem %s803_s13, %s268_s17  ;;  %s292_s22 = sld [smem:[#allocation3 + %s291_s12]] }
  0x49   : > { %v272_v29 = vstv %s271_s26  ;;  %v270_v30 = vld [vmem:[%s269_s15] sm:$0x1]  ;;  %s295_s0 = sld [smem:[#allocation4 + %s291_s12]]  ;;  %s316_s28 = sadd.s32 3, %s798_s8 }
  0x4a   : > { %s301_s21 = sld [smem:[#allocation3 + %s300_s14]]  ;;  %v265_v31 = vadd.f32 %v264_v27, %v257_v28  ;;  %v273_v32 = vmul.f32 %v272_v29, %v270_v30  ;;  %s277_s24 = scalar_lea.vmem %s803_s13, %s276_s5 }
  0x4b   : > { %s304_s23 = sld [smem:[#allocation4 + %s300_s14]]  ;;  %v278_v33 = vld [vmem:[%s277_s24] sm:$0x1]  ;;  %v280_v34 = vstv %s279_s10  ;;  %s324_s12 = sadd.s32 3, %s816_s25 }
  0x4c   : > { %266 = vst.msk [vmem:[%s808_s16 + $0x1] sm:$0x1] %vm232_vm0, %v265_v31  ;;  %v281_v35 = vmul.f32 %v280_v34, %v278_v33  ;;  %s285_s17 = scalar_lea.vmem %s803_s13, %s284_s11  ;;  %s309_s26 = sld [smem:[#allocation3 + %s308_s27]] }
  0x4d   : > { %v288_v36 = vstv %s287_s6  ;;  %v286_v37 = vld [vmem:[%s285_s17] sm:$0x1]  ;;  %s312_s29 = sld [smem:[#allocation4 + %s308_s27]]  ;;  %s333_s14 = sadd.s32 4, %s789_s4 }
  0x4e   : > { %s317_s30 = sld [smem:[#allocation3 + %s316_s28]]  ;;  %v282_v38 = vadd.f32 %v281_v35, %v273_v32  ;;  %v289_v39 = vmul.f32 %v288_v36, %v286_v37  ;;  %s293_s5 = scalar_lea.vmem %s803_s13, %s292_s22 }
  0x4f   : > { %s320_s9 = sld [smem:[#allocation4 + %s316_s28]]  ;;  %v294_v40 = vld [vmem:[%s293_s5] sm:$0x1]  ;;  %v296_v41 = vstv %s295_s0  ;;  %s341_s15 = sadd.s32 4, %s795_s7 }
  0x50   : > { %s302_s10 = scalar_lea.vmem %s803_s13, %s301_s21  ;;  %v290_v42 = vadd.f32 %v289_v39, %v282_v38  ;;  %v297_v43 = vmul.f32 %v296_v41, %v294_v40  ;;  %s325_s11 = sld [smem:[#allocation3 + %s324_s12]] }
  0x51   : > { %v303_v44 = vld [vmem:[%s302_s10] sm:$0x1]  ;;  %v305_v45 = vstv %s304_s23  ;;  %s328_s6 = sld [smem:[#allocation4 + %s324_s12]]  ;;  %s349_s28 = sadd.s32 4, %s798_s8 }
  0x52   : > { %v298_v46 = vadd.f32 %v297_v43, %v290_v42  ;;  %v306_v47 = vmul.f32 %v305_v45, %v303_v44  ;;  %s310_s22 = scalar_lea.vmem %s803_s13, %s309_s26  ;;  %s334_s24 = sld [smem:[#allocation3 + %s333_s14]] }
  0x53   : > { %v311_v48 = vld [vmem:[%s310_s22] sm:$0x1]  ;;  %v313_v49 = vstv %s312_s29  ;;  %s337_s21 = sld [smem:[#allocation4 + %s333_s14]]  ;;  %s357_s17 = sadd.s32 4, %s816_s25 }
  0x54   : > { %s318_s0 = scalar_lea.vmem %s803_s13, %s317_s30  ;;  %299 = vst.msk [vmem:[%s808_s16 + $0x2] sm:$0x1] %vm232_vm0, %v298_v46  ;;  %v314_v50 = vmul.f32 %v313_v49, %v311_v48  ;;  %s342_s23 = sld [smem:[#allocation3 + %s341_s15]] }
  0x55   : > { %v319_v51 = vld [vmem:[%s318_s0] sm:$0x1]  ;;  %v321_v52 = vstv %s320_s9  ;;  %s345_s27 = sld [smem:[#allocation4 + %s341_s15]]  ;;  %s366_s12 = sadd.s32 5, %s789_s4 }
  0x56   : > { %v322_v53 = vmul.f32 %v321_v52, %v319_v51  ;;  %v315_v54 = vadd.f32 %v314_v50, %v306_v47  ;;  %s326_s26 = scalar_lea.vmem %s803_s13, %s325_s11  ;;  %s350_s29 = sld [smem:[#allocation3 + %s349_s28]] }
  0x57   : > { %v329_v55 = vstv %s328_s6  ;;  %v327_v56 = vld [vmem:[%s326_s26] sm:$0x1]  ;;  %s353_s30 = sld [smem:[#allocation4 + %s349_s28]]  ;;  %s374_s14 = sadd.s32 5, %s795_s7 }
  0x58   : > { %s358_s5 = sld [smem:[#allocation3 + %s357_s17]]  ;;  %v323_v57 = vadd.f32 %v322_v53, %v315_v54  ;;  %v330_v58 = vmul.f32 %v329_v55, %v327_v56  ;;  %s335_s10 = scalar_lea.vmem %s803_s13, %s334_s24 }
  0x59   : > { %s361_s9 = sld [smem:[#allocation4 + %s357_s17]]  ;;  %v336_v59 = vld [vmem:[%s335_s10] sm:$0x1]  ;;  %v338_v60 = vstv %s337_s21  ;;  %s382_s28 = sadd.s32 5, %s798_s8 }
  0x5a   : > { %v331_v61 = vadd.f32 %v330_v58, %v323_v57  ;;  %v339_v62 = vmul.f32 %v338_v60, %v336_v59  ;;  %s343_s11 = scalar_lea.vmem %s803_s13, %s342_s23  ;;  %s367_s6 = sld [smem:[#allocation3 + %s366_s12]] }
  0x5b   : > { %v346_v63 = vstv %s345_s27  ;;  %v344_v0 = vld [vmem:[%s343_s11] sm:$0x1]  ;;  %s370_s15 = sld [smem:[#allocation4 + %s366_s12]]  ;;  %s390_s17 = sadd.s32 5, %s816_s25 }
  0x5c   : > { %s375_s22 = sld [smem:[#allocation3 + %s374_s14]]  ;;  %332 = vst.msk [vmem:[%s808_s16 + $0x3] sm:$0x1] %vm232_vm0, %v331_v61  ;;  %v347_v1 = vmul.f32 %v346_v63, %v344_v0  ;;  %s351_s24 = scalar_lea.vmem %s803_s13, %s350_s29 }
  0x5d   : > { %s378_s0 = sld [smem:[#allocation4 + %s374_s14]]  ;;  %v352_v2 = vld [vmem:[%s351_s24] sm:$0x1]  ;;  %v354_v3 = vstv %s353_s30  ;;  %s399_s26 = sadd.s32 6, %s789_s4 }
  0x5e   : > { %s359_s21 = scalar_lea.vmem %s803_s13, %s358_s5  ;;  %v348_v4 = vadd.f32 %v347_v1, %v339_v62  ;;  %v355_v5 = vmul.f32 %v354_v3, %v352_v2  ;;  %s383_s23 = sld [smem:[#allocation3 + %s382_s28]] }
  0x5f   : > { %v360_v6 = vld [vmem:[%s359_s21] sm:$0x1]  ;;  %v362_v7 = vstv %s361_s9  ;;  %s386_s27 = sld [smem:[#allocation4 + %s382_s28]]  ;;  %s407_s14 = sadd.s32 6, %s795_s7 }
  0x60   : > { %v363_v8 = vmul.f32 %v362_v7, %v360_v6  ;;  %v356_v9 = vadd.f32 %v355_v5, %v348_v4  ;;  %s368_s29 = scalar_lea.vmem %s803_s13, %s367_s6  ;;  %s391_s10 = sld [smem:[#allocation3 + %s390_s17]] }
  0x61   : > { %v369_v10 = vld [vmem:[%s368_s29] sm:$0x1]  ;;  %v371_v11 = vstv %s370_s15  ;;  %s394_s5 = sld [smem:[#allocation4 + %s390_s17]]  ;;  %s415_s11 = sadd.s32 6, %s798_s8 }
  0x62   : > { %s376_s30 = scalar_lea.vmem %s803_s13, %s375_s22  ;;  %v364_v12 = vadd.f32 %v363_v8, %v356_v9  ;;  %v372_v13 = vmul.f32 %v371_v11, %v369_v10  ;;  %s400_s9 = sld [smem:[#allocation3 + %s399_s26]] }
  0x63   : > { %v377_v14 = vld [vmem:[%s376_s30] sm:$0x1]  ;;  %v379_v15 = vstv %s378_s0  ;;  %s403_s12 = sld [smem:[#allocation4 + %s399_s26]]  ;;  %s423_s28 = sadd.s32 6, %s816_s25 }
  0x64   : > { %v380_v16 = vmul.f32 %v379_v15, %v377_v14  ;;  %365 = vst.msk [vmem:[%s808_s16 + $0x4] sm:$0x1] %vm232_vm0, %v364_v12  ;;  %s384_s6 = scalar_lea.vmem %s803_s13, %s383_s23  ;;  %s408_s15 = sld [smem:[#allocation3 + %s407_s14]] }
  0x65   : > { %v387_v17 = vstv %s386_s27  ;;  %v385_v19 = vld [vmem:[%s384_s6] sm:$0x1]  ;;  %s411_s22 = sld [smem:[#allocation4 + %s407_s14]]  ;;  %s432_s17 = sadd.s32 7, %s789_s4 }
  0x66   : > { %v381_v18 = vadd.f32 %v380_v16, %v372_v13  ;;  %s416_s24 = sld [smem:[#allocation3 + %s415_s11]]  ;;  %v388_v20 = vmul.f32 %v387_v17, %v385_v19  ;;  %s392_s21 = scalar_lea.vmem %s803_s13, %s391_s10 }
  0x67   : > { %s419_s0 = sld [smem:[#allocation4 + %s415_s11]]  ;;  %v393_v21 = vld [vmem:[%s392_s21] sm:$0x1]  ;;  %v395_v22 = vstv %s394_s5  ;;  %s440_s5 = sadd.s32 7, %s795_s7 }
  0x68   : > { %v389_v23 = vadd.f32 %v388_v20, %v381_v18  ;;  %v396_v24 = vmul.f32 %v395_v22, %v393_v21  ;;  %s401_s23 = scalar_lea.vmem %s803_s13, %s400_s9  ;;  %s424_s27 = sld [smem:[#allocation3 + %s423_s28]] }
  0x69   : > { %v404_v25 = vstv %s403_s12  ;;  %v402_v26 = vld [vmem:[%s401_s23] sm:$0x1]  ;;  %s427_s26 = sld [smem:[#allocation4 + %s423_s28]]  ;;  %s448_s14 = sadd.s32 7, %s798_s8 }
  0x6a   : > { %s433_s29 = sld [smem:[#allocation3 + %s432_s17]]  ;;  %v397_v27 = vadd.f32 %v396_v24, %v389_v23  ;;  %v405_v28 = vmul.f32 %v404_v25, %v402_v26  ;;  %s409_s10 = scalar_lea.vmem %s803_s13, %s408_s15 }
  0x6b   : > { %s436_s30 = sld [smem:[#allocation4 + %s432_s17]]  ;;  %v410_v29 = vld [vmem:[%s409_s10] sm:$0x1]  ;;  %v412_v30 = vstv %s411_s22  ;;  %s456_s11 = sadd.s32 7, %s816_s25 }
  0x6c   : > { %s417_s4 = scalar_lea.vmem %s803_s13, %s416_s24  ;;  %398 = vst.msk [vmem:[%s808_s16 + $0x5] sm:$0x1] %vm232_vm0, %v397_v27  ;;  %v413_v31 = vmul.f32 %v412_v30, %v410_v29  ;;  %s441_s9 = sld [smem:[#allocation3 + %s440_s5]] }
  0x6d   : > { %v418_v32 = vld [vmem:[%s417_s4] sm:$0x1]  ;;  %v420_v33 = vstv %s419_s0  ;;  %s444_s12 = sld [smem:[#allocation4 + %s440_s5]] }
  0x6e   : > { %v421_v34 = vmul.f32 %v420_v33, %v418_v32  ;;  %v414_v35 = vadd.f32 %v413_v31, %v405_v28  ;;  %s425_s6 = scalar_lea.vmem %s803_s13, %s424_s27  ;;  %s449_s15 = sld [smem:[#allocation3 + %s448_s14]] }
  0x6f   : > { %v426_v36 = vld [vmem:[%s425_s6] sm:$0x1]  ;;  %v428_v37 = vstv %s427_s26  ;;  %s452_s7 = sld [smem:[#allocation4 + %s448_s14]] }
  0x70   : > { %s434_s22 = scalar_lea.vmem %s803_s13, %s433_s29  ;;  %v422_v38 = vadd.f32 %v421_v34, %v414_v35  ;;  %v429_v39 = vmul.f32 %v428_v37, %v426_v36  ;;  %s457_s24 = sld [smem:[#allocation3 + %s456_s11]] }
  0x71   : > { %v435_v40 = vld [vmem:[%s434_s22] sm:$0x1]  ;;  %v437_v41 = vstv %s436_s30  ;;  %s460_s21 = sld [smem:[#allocation4 + %s456_s11]] }
  0x72   : > { %v430_v42 = vadd.f32 %v429_v39, %v422_v38  ;;  %v438_v43 = vmul.f32 %v437_v41, %v435_v40  ;;  %s442_s8 = scalar_lea.vmem %s803_s13, %s441_s9 }
  0x73   : > { %v445_v44 = vstv %s444_s12  ;;  %v443_v45 = vld [vmem:[%s442_s8] sm:$0x1] }
  0x74   : > { %431 = vst.msk [vmem:[%s808_s16 + $0x6] sm:$0x1] %vm232_vm0, %v430_v42  ;;  %v446_v46 = vmul.f32 %v445_v44, %v443_v45  ;;  %s450_s25 = scalar_lea.vmem %s803_s13, %s449_s15 }
  0x75   : > { %v451_v47 = vld [vmem:[%s450_s25] sm:$0x1]  ;;  %v453_v48 = vstv %s452_s7 }
  0x76   : > { %v447_v49 = vadd.f32 %v446_v46, %v438_v43  ;;  %v454_v50 = vmul.f32 %v453_v48, %v451_v47  ;;  %s458_s0 = scalar_lea.vmem %s803_s13, %s457_s24 }
  0x77   : > { %v461_v51 = vstv %s460_s21  ;;  %v459_v52 = vld [vmem:[%s458_s0] sm:$0x1] }
  0x78   : > { %v455_v53 = vadd.f32 %v454_v50, %v447_v49  ;;  %v462_v54 = vmul.f32 %v461_v51, %v459_v52 }
  0x7a   : > { %v463_v55 = vadd.f32 %v462_v54, %v455_v53 }
  0x7c   : > { %464 = vst.msk [vmem:[%s808_s16 + $0x7] sm:$0x1] %vm232_vm0, %v463_v55 }
  0x7d PF: > { %s20_s19 = sadd.s32 1, %s708_s19   ;;  %s911_s17 = smov %s704_s18 }
  0x7e   : > { %p17_p7 = scmp.ge.s32.totalorder %s20_s19, 4   ;;  %s912_s18 = smov %s914_s20 }
  0x80   :  { %19 = sbr.rel (!%p17_p7) target bundleno = 17 (0x11), region = 95 }
  0x87   :  { %490 = vsyncpa [#allocation5], 1 }
  0x88   :  { %492 = vsyncpa [#allocation5 + $0x1], 1 }

</bundles_post_ra>
